<compile_context>
chip_gen: v7x
topology: tpu7x:2x2x1
jax: 0.10.0
libtpu: 0.0.40
codegen_flags: <defaults>
</compile_context>

<pallas_src>
import jax
import jax.numpy as jnp
from jax import lax
from jax.experimental import pallas as pl
from jax.experimental.pallas import tpu as pltpu

BN_EPS = 1e-5


def fused_feature_blocks_kernel(x_ref, w_ref, gb_ref, o_ref):
    """One grid step == one group of `hpg` FeatureBlock heads.

    x_ref : (hpg, N, D_in)      activations (bf16)
    w_ref : (hpg, D_in, D_low)  pre-transposed Linear weights (bf16)
    gb_ref: (NB,  2, D_low)     resident packed [gamma; beta] for ALL heads (f32)
    o_ref : (hpg, N, D_low)
    """
    hpg = x_ref.shape[0]
    g = pl.program_id(0)

    # ---- Linear (bias dropped: cancelled by training-mode BN), batched over heads ----
    y = lax.dot_general(
        x_ref[...], w_ref[...],
        dimension_numbers=(((2,), (1,)), ((0,), (0,))),
        preferred_element_type=jnp.float32,
    )                                                        # (hpg, N, D_low) f32

    # ---- BatchNorm1d, training mode (biased batch stats), two-pass variance ----
    n = y.shape[1]
    inv_n = 1.0 / n
    mean = jnp.sum(y, axis=1, keepdims=True) * inv_n         # (hpg, 1, D_low)
    centered = y - mean
    var = jnp.sum(centered * centered, axis=1, keepdims=True) * inv_n
    inv_std = lax.rsqrt(var + BN_EPS)

    # Slice this group's gamma/beta out of the resident (NB, 2, D_low) buffer.
    gb = gb_ref[pl.ds(g * hpg, hpg)]                         # (hpg, 2, D_low)
    gamma = gb[:, 0:1, :]
    beta = gb[:, 1:2, :]

    # Fold the affine: o = y * scale + shift  (mul + add per element on the VPU).
    scale = inv_std * gamma
    shift = beta - mean * scale
    o_ref[...] = (y * scale + shift).astype(o_ref.dtype)


def _num_tensorcores():
    """2-way parallel grid on v7x (2 TensorCores/chip); 1 otherwise."""
    try:
        kind = getattr(jax.devices()[0], "device_kind", "") or ""
    except Exception:
        return 1
    return 2 if "v7" in kind.lower() else 1


def fused_feature_blocks(x_parts, w_stack, gb_stack, *, num_groups=None,
                         out_dtype=jnp.float32):
    """x_parts: (B, N, D_in) part features; w_stack: (B, D_in, D_low) pre-transposed
    Linear weights; gb_stack: (B, 2, D_low) packed [gamma; beta].
    Returns (B, N, D_low) training-mode BN(Linear(x))."""
    nb, n, d_in = x_parts.shape
    d_low = w_stack.shape[-1]

    if num_groups is None:
        num_groups = _num_tensorcores()
    if nb % num_groups != 0:
        num_groups = 1
    hpg = nb // num_groups

    # bf16 inputs halve the dominant HBM streams; the MXU takes bf16 natively and
    # accumulates in f32 (preferred_element_type), so BN math stays f32.
    x_lp = x_parts.astype(jnp.bfloat16)
    w_lp = w_stack.astype(jnp.bfloat16)

    # TODO(synk): at realistic embed_net sizes (D_in=2048, D_low=512) budget VMEM
    # explicitly on v7x (64 MiB physical) via pltpu.CompilerParams(vmem_limit_bytes=...).
    return pl.pallas_call(
        fused_feature_blocks_kernel,
        out_shape=jax.ShapeDtypeStruct((nb, n, d_low), out_dtype),
        grid_spec=pltpu.PrefetchScalarGridSpec(
            num_scalar_prefetch=0,
            grid=(num_groups,),
            in_specs=[
                pl.BlockSpec((hpg, n, d_in), lambda g: (g, 0, 0)),
                pl.BlockSpec((hpg, d_in, d_low), lambda g: (g, 0, 0)),
                # gamma/beta resident: constant index_map -> DMA'd once, kept in VMEM.
                pl.BlockSpec((nb, 2, d_low), lambda g: (0, 0, 0)),
            ],
            out_specs=pl.BlockSpec((hpg, n, d_low), lambda g: (g, 0, 0)),
        ),
        compiler_params=pltpu.CompilerParams(
            dimension_semantics=("parallel",),
        ),
    )(x_lp, w_lp, gb_stack)


def init_params(key, num_blocks, input_dim, low_dim):
    """Matches FeatureBlock's weights_init_kaiming for all heads at once."""
    k_w, k_g = jax.random.split(key)
    # Linear: kaiming_normal_(a=0, mode='fan_out') -> std = sqrt(2 / out_features).
    # Stored pre-transposed as (B, D_in, D_low) so the kernel's RHS is already in
    # the lane-dense orientation. Linear bias is zero-init and a no-op under
    # training-mode BN -> dropped.
    w = jax.random.normal(k_w, (num_blocks, input_dim, low_dim), jnp.float32) * jnp.sqrt(
        2.0 / low_dim
    )
    # BatchNorm1d: weight ~ N(1.0, 0.01), bias = 0. Packed as (B, 2, D_low).
    gamma = 1.0 + 0.01 * jax.random.normal(k_g, (num_blocks, low_dim), jnp.float32)
    beta = jnp.zeros((num_blocks, low_dim), jnp.float32)
    gb = jnp.stack([gamma, beta], axis=1)                    # (B, 2, D_low)
    return w, gb


if __name__ == "__main__":
    key = jax.random.PRNGKey(0)
    k_x, k_p = jax.random.split(key)

    # Small shapes consistent with the module structure: 6 part-feature heads,
    # batch N, pool_dim -> low_dim projection (lane-dense D_low, multiple of 128).
    NUM_BLOCKS, N, INPUT_DIM, LOW_DIM = 6, 16, 256, 128

    x_parts = jax.random.normal(k_x, (NUM_BLOCKS, N, INPUT_DIM), jnp.float32)
    w_stack, gb_stack = init_params(k_p, NUM_BLOCKS, INPUT_DIM, LOW_DIM)

    out = fused_feature_blocks(x_parts, w_stack, gb_stack)
    jax.block_until_ready(out)

    # Pure-JAX reference: per-head Linear (zero bias) then training-mode
    # BatchNorm1d over the batch axis, using the SAME bf16-rounded operands the
    # kernel consumes (accumulation in f32).
    x_lp = x_parts.astype(jnp.bfloat16).astype(jnp.float32)
    w_lp = w_stack.astype(jnp.bfloat16).astype(jnp.float32)
    gamma = gb_stack[:, 0, :][:, None, :]                    # (B, 1, D_low)
    beta = gb_stack[:, 1, :][:, None, :]
    y_ref = jnp.einsum("bnd,bdo->bno", x_lp, w_lp)
    mean = y_ref.mean(axis=1, keepdims=True)
    var = ((y_ref - mean) ** 2).mean(axis=1, keepdims=True)
    ref = (y_ref - mean) / jnp.sqrt(var + BN_EPS) * gamma + beta

    assert out.shape == (NUM_BLOCKS, N, LOW_DIM)
    assert jnp.allclose(out, ref, atol=2e-3, rtol=2e-3), "mismatch vs reference"

    print("KERNEL_OK")
</pallas_src>

<mosaic_0001>
module attributes {stable_mosaic.version = 11 : i64} {
  func.func @fused_feature_blocks_kernel(%arg0: i32, %arg1: memref<6x16x256xbf16, #tpu.memory_space<vmem>>, %arg2: memref<6x256x128xbf16, #tpu.memory_space<vmem>>, %arg3: memref<6x2x128xf32, #tpu.memory_space<vmem>>, %arg4: memref<6x16x128xf32, #tpu.memory_space<vmem>>) attributes {dimension_semantics = [#tpu.dimension_semantics<parallel>], iteration_bounds = array<i64: 1>, scalar_prefetch = 0 : i64, scratch_operands = 0 : i64, tpu.core_type = #tpu.core_type<tc>, window_params = [{transform_indices = @transform_0, window_bounds = array<i64: 6, 16, 256>}, {transform_indices = @transform_1, window_bounds = array<i64: 6, 256, 128>}, {pipeline_mode = #tpu.pipeline_mode<synchronous>, transform_indices = @transform_2, window_bounds = array<i64: 6, 2, 128>}, {transform_indices = @transform_3, window_bounds = array<i64: 6, 16, 128>}]} {
    %c0 = arith.constant 0 : index
    %c0_0 = arith.constant 0 : index
    %c0_1 = arith.constant 0 : index
    %0 = vector.load %arg1[%c0, %c0_0, %c0_1] : memref<6x16x256xbf16, #tpu.memory_space<vmem>>, vector<6x16x256xbf16>
    %c0_2 = arith.constant 0 : index
    %c0_3 = arith.constant 0 : index
    %c0_4 = arith.constant 0 : index
    %1 = vector.load %arg2[%c0_2, %c0_3, %c0_4] : memref<6x256x128xbf16, #tpu.memory_space<vmem>>, vector<6x256x128xbf16>
    %cst = arith.constant dense<0.000000e+00> : vector<6x16x128xf32>
    %2 = tpu.matmul %0, %1, %cst {dimension_numbers = #tpu.dot_dimension_numbers<[2], [1], [1], [2], [0, 0, 0, 1, 1, 2], [0], [0]>} : vector<6x16x256xbf16>, vector<6x256x128xbf16>, vector<6x16x128xf32> -> vector<6x16x128xf32>
    %cst_5 = arith.constant dense<0.000000e+00> : vector<6x128xf32>
    %3 = vector.multi_reduction <add>, %2, %cst_5 [1] : vector<6x16x128xf32> to vector<6x128xf32>
    %4 = vector.shape_cast %3 : vector<6x128xf32> to vector<6x1x128xf32>
    %cst_6 = arith.constant 6.250000e-02 : f32
    %5 = vector.broadcast %cst_6 : f32 to vector<6x1x128xf32>
    %6 = arith.mulf %4, %5 : vector<6x1x128xf32>
    %7 = vector.broadcast %6 : vector<6x1x128xf32> to vector<6x16x128xf32>
    %8 = arith.subf %2, %7 : vector<6x16x128xf32>
    %9 = arith.mulf %8, %8 : vector<6x16x128xf32>
    %cst_7 = arith.constant dense<0.000000e+00> : vector<6x128xf32>
    %10 = vector.multi_reduction <add>, %9, %cst_7 [1] : vector<6x16x128xf32> to vector<6x128xf32>
    %11 = vector.shape_cast %10 : vector<6x128xf32> to vector<6x1x128xf32>
    %cst_8 = arith.constant 6.250000e-02 : f32
    %12 = vector.broadcast %cst_8 : f32 to vector<6x1x128xf32>
    %13 = arith.mulf %11, %12 : vector<6x1x128xf32>
    %cst_9 = arith.constant 9.99999974E-6 : f32
    %14 = vector.broadcast %cst_9 : f32 to vector<6x1x128xf32>
    %15 = arith.addf %13, %14 : vector<6x1x128xf32>
    %16 = math.rsqrt %15 : vector<6x1x128xf32>
    %c6_i32 = arith.constant 6 : i32
    %17 = arith.muli %arg0, %c6_i32 : i32
    %18 = arith.index_cast %17 : i32 to index
    %c0_10 = arith.constant 0 : index
    %c0_11 = arith.constant 0 : index
    %19 = vector.load %arg3[%18, %c0_10, %c0_11] : memref<6x2x128xf32, #tpu.memory_space<vmem>>, vector<6x2x128xf32>
    %20 = vector.extract_strided_slice %19 {offsets = [0, 0, 0], sizes = [6, 1, 128], strides = [1, 1, 1]} : vector<6x2x128xf32> to vector<6x1x128xf32>
    %21 = vector.extract_strided_slice %19 {offsets = [0, 1, 0], sizes = [6, 1, 128], strides = [1, 1, 1]} : vector<6x2x128xf32> to vector<6x1x128xf32>
    %22 = arith.mulf %16, %20 : vector<6x1x128xf32>
    %23 = arith.mulf %6, %22 : vector<6x1x128xf32>
    %24 = arith.subf %21, %23 : vector<6x1x128xf32>
    %25 = vector.broadcast %22 : vector<6x1x128xf32> to vector<6x16x128xf32>
    %26 = arith.mulf %2, %25 : vector<6x16x128xf32>
    %27 = vector.broadcast %24 : vector<6x1x128xf32> to vector<6x16x128xf32>
    %28 = arith.addf %26, %27 : vector<6x16x128xf32>
    %c0_12 = arith.constant 0 : index
    %c0_13 = arith.constant 0 : index
    %c0_14 = arith.constant 0 : index
    %29 = vector.load %arg4[%c0_12, %c0_13, %c0_14] : memref<6x16x128xf32, #tpu.memory_space<vmem>>, vector<6x16x128xf32>
    tpu.vector_store %arg4[%c0_12, %c0_13, %c0_14], %28 {strides = array<i32>} : memref<6x16x128xf32, #tpu.memory_space<vmem>>, vector<6x16x128xf32>,
    return
  }
  func.func @transform_0(%arg0: i32) -> (i32, i32, i32) {
    %c0_i32 = arith.constant 0 : i32
    %c0_i32_0 = arith.constant 0 : i32
    %c0_i32_1 = arith.constant 0 : i32
    return %arg0, %c0_i32, %c0_i32_0 : i32, i32, i32
  }
  func.func @transform_1(%arg0: i32) -> (i32, i32, i32) {
    %c0_i32 = arith.constant 0 : i32
    %c0_i32_0 = arith.constant 0 : i32
    %c0_i32_1 = arith.constant 0 : i32
    return %arg0, %c0_i32, %c0_i32_0 : i32, i32, i32
  }
  func.func @transform_2(%arg0: i32) -> (i32, i32, i32) {
    %c0_i32 = arith.constant 0 : i32
    %c0_i32_0 = arith.constant 0 : i32
    %c0_i32_1 = arith.constant 0 : i32
    %c0_i32_2 = arith.constant 0 : i32
    return %c0_i32, %c0_i32_0, %c0_i32_1 : i32, i32, i32
  }
  func.func @transform_3(%arg0: i32) -> (i32, i32, i32) {
    %c0_i32 = arith.constant 0 : i32
    %c0_i32_0 = arith.constant 0 : i32
    %c0_i32_1 = arith.constant 0 : i32
    return %arg0, %c0_i32, %c0_i32_0 : i32, i32, i32
  }
}

</mosaic_0001>

<bundles_post_ra>
// kernel: tpu_custom_call.1
= control target key start
LH: loop header
LB: loop body
LE: loop exit
PB: predicated region body
PF: predicated region fallthrough
CT: control target
= control target key end

     0   :  { %8 = vsyncpa [#allocation3], 0  ;;  %s2072_s0 = inlined_call_operand.hbm [shape: bf16[6,16,256], index: 0, kind: input, shape index: {}]   ;;  %s2073_s1 = inlined_call_operand.hbm [shape: bf16[6,256,128], index: 1, kind: input, shape index: {}]   ;;  %s2074_s2 = inlined_call_operand.hbm [shape: f32[6,2,128], index: 2, kind: input, shape index: {}]   ;;  %s2075_s3 = inlined_call_operand.hbm [shape: f32[6,16,128], index: 3, kind: output, shape index: {}]  }
   0x1   :  { %9 = vsyncpa [#allocation6], 0 }
   0x2   :  { %10 = vsyncpa [#allocation4], 0  ;;  %s1892_s12 = smov [#allocation5]   ;;  %s1798_s16 = scalar_lea.hbm %s2073_s1, 12288 }
   0x3   :  { %s28_s13 = sshll.u32 %s1892_s12, 4  ;;  %p1799_p0 = scmp.ne.s32.totalorder %s2073_s1, %s1798_s16  ;;  %s29_s13 = int_to_ptr.vmem [resolvable:$true] %s28_s13 }
   0x4   :  { %p1802_p1 = scmp.lt.u32.totalorder %s1798_s16, %s2073_s1 }
   0x6   :  { %p1804_p2 = pnand %p1802_p1, %p1799_p0 }
   0x8   :  { %1807 = shalt.err (!%p1804_p2)
}
   0x9   :  { %s1808_s21 = scalar_lea.vmem %s29_s13, 12288  ;;  %p1813_p4 = scmp.lt.s32.totalorder %s29_s13, %s29_s13 }
   0xa   :  { %p1809_p3 = scmp.ne.s32.totalorder %s29_s13, %s1808_s21  ;;  %p1814_p5 = scmp.lt.s32.totalorder %s1808_s21, %s1808_s21 }
   0xc   :  { %p1815_p6 = por %p1814_p5, %p1813_p4 }
   0xe   :  { %p1816_p7 = pnand %p1815_p6, %p1809_p3 }
  0x10   :  { %1819 = shalt.err (!%p1816_p7)
}
  0x11   :  { %s1893_s22 = smov 64   ;;  %s1894_s23 = smov 4  }
  0x12   :  { %34 = dma.hbm_to_vmem [thread:$0]  %s2073_s1, 12288, %s29_s13, [#allocation6], %s1893_s22, %s1893_s22, %s1894_s23  }
  0x13   :  { %s1895_s26 = smov [#allocation2]   ;;  %s1820_s30 = scalar_lea.hbm %s2072_s0, 1536 }
  0x14   :  { %s16_s27 = sshll.u32 %s1895_s26, 4  ;;  %p1821_p8 = scmp.ne.s32.totalorder %s2072_s0, %s1820_s30  ;;  %s17_s27 = int_to_ptr.vmem [resolvable:$true] %s16_s27 }
  0x15   :  { %p1824_p9 = scmp.lt.u32.totalorder %s1820_s30, %s2072_s0 }
  0x17   :  { %p1826_p10 = pnand %p1824_p9, %p1821_p8 }
  0x19   :  { %1829 = shalt.err (!%p1826_p10)
}
  0x1a   :  { %s1830_s8 = scalar_lea.vmem %s17_s27, 1536  ;;  %p1835_p12 = scmp.lt.s32.totalorder %s17_s27, %s17_s27 }
  0x1b   :  { %p1831_p11 = scmp.ne.s32.totalorder %s17_s27, %s1830_s8  ;;  %p1836_p13 = scmp.lt.s32.totalorder %s1830_s8, %s1830_s8 }
  0x1d   :  { %p1837_p0 = por %p1836_p13, %p1835_p12 }
  0x1f   :  { %p1838_p1 = pnand %p1837_p0, %p1831_p11 }
  0x21   :  { %1841 = shalt.err (!%p1838_p1)
}
  0x22   :  { %s1896_s1 = smov 128   ;;  %s1897_s9 = smov 8  }
  0x23   :  { %22 = dma.hbm_to_vmem [thread:$0]  %s2072_s0, 1536, %s17_s27, [#allocation3], %s1896_s1, %s1896_s1, %s1897_s9  }
  0x24   :  { %s1898_s12 = smov [#allocation7]   ;;  %s1842_s16 = scalar_lea.hbm %s2074_s2, 192 }
  0x25   :  { %s40_s13 = sshll.u32 %s1898_s12, 4  ;;  %p1843_p2 = scmp.ne.s32.totalorder %s2074_s2, %s1842_s16  ;;  %s41_s13 = int_to_ptr.vmem [resolvable:$true] %s40_s13 }
  0x26   :  { %p1846_p3 = scmp.lt.u32.totalorder %s1842_s16, %s2074_s2 }
  0x28   :  { %p1848_p4 = pnand %p1846_p3, %p1843_p2 }
  0x2a   :  { %1851 = shalt.err (!%p1848_p4)
}
  0x2b   :  { %s1852_s21 = scalar_lea.vmem %s41_s13, 192  ;;  %p1857_p6 = scmp.lt.s32.totalorder %s41_s13, %s41_s13 }
  0x2c   :  { %p1853_p5 = scmp.ne.s32.totalorder %s41_s13, %s1852_s21  ;;  %p1858_p7 = scmp.lt.s32.totalorder %s1852_s21, %s1852_s21 }
  0x2e   :  { %p1859_p8 = por %p1858_p7, %p1857_p6 }
  0x30   :  { %p1860_p9 = pnand %p1859_p8, %p1853_p5 }
  0x32   :  { %1863 = shalt.err (!%p1860_p9)
}
  0x33   :  { %s1899_s0 = smov 32   ;;  %s1900_s22 = smov 2  }
  0x34   :  { %46 = dma.hbm_to_vmem [thread:$0]  %s2074_s2, 192, %s41_s13, [#allocation6], %s1899_s0, %s1899_s0, %s1900_s22  }
  0x35   :  { %1886 = dma.done.wait [#allocation3], 1536  }
  0x36   :  { %1887 = vsyncadd [#allocation3], 4294965760 }
  0x37   :  { %1888 = dma.done.wait [#allocation6], 12480  }
  0x38   :  { %1889 = vsyncadd [#allocation6], 4294954816  ;;  %v1672_v0 = vld [vmem:[#allocation5 + $0x40] sm:$0xff]   ;;  %v1676_v4 = vld [vmem:[#allocation5 + $0x48] sm:$0xff]   ;;  %s1901_s2 = smov [#allocation8]  }
  0x39   :  { %v1673_v1 = vld [vmem:[#allocation5 + $0xc0] sm:$0xff]   ;;  %1530 = vmatprep.subr.bf16.mxu0 %v1672_v0  ;;  %v1677_v5 = vld [vmem:[#allocation5 + $0xc8] sm:$0xff]   ;;  %v1680_v8 = vld [vmem:[#allocation5 + $0x50] sm:$0xff]   ;;  %s1409_s25 = sshll.u32 %s1901_s2, 4  ;;  %s1410_s25 = int_to_ptr.vmem [resolvable:$true] %s1409_s25 }
  0x3a   :  { %v1674_v2 = vld [vmem:[#allocation5] sm:$0xff]   ;;  %1552 = vmatprep.subr.bf16.mxu1 %v1673_v1  ;;  %v1678_v6 = vld [vmem:[#allocation5 + $0x8] sm:$0xff]   ;;  %v1681_v9 = vld [vmem:[#allocation5 + $0xd0] sm:$0xff]   ;;  %s1864_s26 = scalar_lea.vmem %s1410_s25, 1536  ;;  %p1869_p11 = scmp.lt.s32.totalorder %s1410_s25, %s1410_s25 }
  0x3b   :  { %v1675_v3 = vld [vmem:[#allocation5 + $0x80] sm:$0xff]   ;;  %1531 = vmatpush3.bf16.msra.mxu0 %v1674_v2  ;;  %v1679_v7 = vld [vmem:[#allocation5 + $0x88] sm:$0xff]   ;;  %v1682_v10 = vld [vmem:[#allocation5 + $0x10] sm:$0xff]   ;;  %p1865_p10 = scmp.ne.s32.totalorder %s1410_s25, %s1864_s26  ;;  %p1870_p12 = scmp.lt.s32.totalorder %s1864_s26, %s1864_s26 }
  0x3c   :  { %1553 = vmatpush3.bf16.msra.mxu1 %v1675_v3  ;;  %1532 = vmatprep.subr.bf16.mxu0 %v1676_v4  ;;  %v1683_v11 = vld [vmem:[#allocation5 + $0x90] sm:$0xff]   ;;  %v1684_v12 = vld [vmem:[#allocation5 + $0x58] sm:$0xff]   ;;  %v1688_v16 = vld [vmem:[#allocation5 + $0x60] sm:$0xff]  }
  0x3d   :  { %1554 = vmatprep.subr.bf16.mxu1 %v1677_v5  ;;  %v1685_v13 = vld [vmem:[#allocation5 + $0xd8] sm:$0xff]   ;;  %v1689_v17 = vld [vmem:[#allocation5 + $0xe0] sm:$0xff]   ;;  %v1692_v20 = vld [vmem:[#allocation5 + $0x68] sm:$0xff]   ;;  %p1871_p13 = por %p1870_p12, %p1869_p11 }
  0x3e   :  { %v1686_v14 = vld [vmem:[#allocation5 + $0x18] sm:$0xff]   ;;  %v1690_v18 = vld [vmem:[#allocation5 + $0x20] sm:$0xff]   ;;  %v1693_v21 = vld [vmem:[#allocation5 + $0xe8] sm:$0xff]  }
  0x3f   :  { %1533 = vmatpush3.bf16.msra.mxu0 %v1678_v6  ;;  %v1687_v15 = vld [vmem:[#allocation5 + $0x98] sm:$0xff]   ;;  %v1691_v19 = vld [vmem:[#allocation5 + $0xa0] sm:$0xff]   ;;  %v1694_v22 = vld [vmem:[#allocation5 + $0x28] sm:$0xff]   ;;  %p1872_p0 = pnand %p1871_p13, %p1865_p10 }
  0x40   :  { %1555 = vmatpush3.bf16.msra.mxu1 %v1679_v7  ;;  %1534 = vmatprep.subr.bf16.mxu0 %v1680_v8  ;;  %v1695_v23 = vld [vmem:[#allocation5 + $0xa8] sm:$0xff]   ;;  %v1696_v24 = vld [vmem:[#allocation5 + $0x70] sm:$0xff]   ;;  %v1700_v28 = vld [vmem:[#allocation5 + $0x78] sm:$0xff]  }
  0x41   :  { %1556 = vmatprep.subr.bf16.mxu1 %v1681_v9  ;;  %v1697_v25 = vld [vmem:[#allocation5 + $0xf0] sm:$0xff]   ;;  %v1701_v29 = vld [vmem:[#allocation5 + $0xf8] sm:$0xff]   ;;  %v1704_v32 = vld [vmem:[#allocation2] ss:$8 sps:$4 sm:$0xff]  }
  0x42   :  { %v1698_v26 = vld [vmem:[#allocation5 + $0x30] sm:$0xff]   ;;  %v1702_v30 = vld [vmem:[#allocation5 + $0x38] sm:$0xff]   ;;  %v1706_v33 = vld [vmem:[#allocation2 + $0x4] ss:$8 sps:$4 sm:$0xff]  }
  0x43   :  { %1535 = vmatpush3.bf16.msra.mxu0 %v1682_v10  ;;  %v1699_v27 = vld [vmem:[#allocation5 + $0xb0] sm:$0xff]   ;;  %v1703_v31 = vld [vmem:[#allocation5 + $0xb8] sm:$0xff]   ;;  %399 = vmatprep.mubr.bf16.mxu0 %v1706_v33  ;;  %v1710_v36 = vld [vmem:[#allocation5 + $0x140] sm:$0xff]  }
  0x44   :  { %1557 = vmatpush3.bf16.msra.mxu1 %v1683_v11  ;;  %1536 = vmatprep.subr.bf16.mxu0 %v1684_v12  ;;  %v1707_v34 = vld [vmem:[#allocation2 + $0x10] ss:$8 sps:$4 sm:$0xff]   ;;  %v1709_v35 = vld [vmem:[#allocation2 + $0x14] ss:$8 sps:$4 sm:$0xff]   ;;  %v1711_v37 = vld [vmem:[#allocation5 + $0x1c0] sm:$0xff]  }
  0x45   :  { %1558 = vmatprep.subr.bf16.mxu1 %v1685_v13  ;;  %546 = vmatprep.mubr.bf16.mxu1 %v1709_v35  ;;  %v1712_v38 = vld [vmem:[#allocation5 + $0x100] sm:$0xff]   ;;  %v1714_v40 = vld [vmem:[#allocation5 + $0x148] sm:$0xff]   ;;  %v1718_v44 = vld [vmem:[#allocation5 + $0x150] sm:$0xff]  }
  0x46   :  { %v1713_v39 = vld [vmem:[#allocation5 + $0x180] sm:$0xff]   ;;  %v1715_v41 = vld [vmem:[#allocation5 + $0x1c8] sm:$0xff]   ;;  %v1719_v45 = vld [vmem:[#allocation5 + $0x1d0] sm:$0xff]  }
  0x47   :  { %1537 = vmatpush3.bf16.msra.mxu0 %v1686_v14  ;;  %v1716_v42 = vld [vmem:[#allocation5 + $0x108] sm:$0xff]   ;;  %v1720_v46 = vld [vmem:[#allocation5 + $0x110] sm:$0xff]   ;;  %v1722_v48 = vld [vmem:[#allocation5 + $0x158] sm:$0xff]  }
  0x48   :  { %1559 = vmatpush3.bf16.msra.mxu1 %v1687_v15  ;;  %1538 = vmatprep.subr.bf16.mxu0 %v1688_v16  ;;  %v1717_v43 = vld [vmem:[#allocation5 + $0x188] sm:$0xff]   ;;  %v1721_v47 = vld [vmem:[#allocation5 + $0x190] sm:$0xff]   ;;  %v1723_v49 = vld [vmem:[#allocation5 + $0x1d8] sm:$0xff]  }
  0x49   :  { %1560 = vmatprep.subr.bf16.mxu1 %v1689_v17  ;;  %v1724_v50 = vld [vmem:[#allocation5 + $0x118] sm:$0xff]   ;;  %v1726_v52 = vld [vmem:[#allocation5 + $0x160] sm:$0xff]   ;;  %v1730_v56 = vld [vmem:[#allocation5 + $0x168] sm:$0xff]  }
  0x4a   :  { %v1725_v51 = vld [vmem:[#allocation5 + $0x198] sm:$0xff]   ;;  %v1727_v53 = vld [vmem:[#allocation5 + $0x1e0] sm:$0xff]   ;;  %v1731_v57 = vld [vmem:[#allocation5 + $0x1e8] sm:$0xff]  }
  0x4b   :  { %1539 = vmatpush3.bf16.msra.mxu0 %v1690_v18  ;;  %v1728_v54 = vld [vmem:[#allocation5 + $0x120] sm:$0xff]   ;;  %v1732_v58 = vld [vmem:[#allocation5 + $0x128] sm:$0xff]   ;;  %v1734_v60 = vld [vmem:[#allocation5 + $0x170] sm:$0xff]  }
  0x4c   :  { %1561 = vmatpush3.bf16.msra.mxu1 %v1691_v19  ;;  %1540 = vmatprep.subr.bf16.mxu0 %v1692_v20  ;;  %v1729_v55 = vld [vmem:[#allocation5 + $0x1a0] sm:$0xff]   ;;  %v1733_v59 = vld [vmem:[#allocation5 + $0x1a8] sm:$0xff]   ;;  %v1735_v61 = vld [vmem:[#allocation5 + $0x1f0] sm:$0xff]  }
  0x4d   :  { %1562 = vmatprep.subr.bf16.mxu1 %v1693_v21  ;;  %v1736_v62 = vld [vmem:[#allocation5 + $0x130] sm:$0xff]   ;;  %v1738_v0 = vld [vmem:[#allocation5 + $0x178] sm:$0xff]   ;;  %v1742_v4 = vld [vmem:[#allocation2 + $0x20] ss:$8 sps:$4 sm:$0xff]  }
  0x4e   :  { %v1737_v63 = vld [vmem:[#allocation5 + $0x1b0] sm:$0xff]   ;;  %v1739_v1 = vld [vmem:[#allocation5 + $0x1f8] sm:$0xff]   ;;  %v1744_v5 = vld [vmem:[#allocation2 + $0x24] ss:$8 sps:$4 sm:$0xff]  }
  0x4f   :  { %1541 = vmatpush3.bf16.msra.mxu0 %v1694_v22  ;;  %v1740_v2 = vld [vmem:[#allocation5 + $0x138] sm:$0xff]   ;;  %v1748_v8 = vld [vmem:[#allocation5 + $0x240] sm:$0xff]   ;;  %v1752_v12 = vld [vmem:[#allocation5 + $0x248] sm:$0xff]  }
  0x50   :  { %1563 = vmatpush3.bf16.msra.mxu1 %v1695_v23  ;;  %1542 = vmatprep.subr.bf16.mxu0 %v1696_v24  ;;  %v1741_v3 = vld [vmem:[#allocation5 + $0x1b8] sm:$0xff]   ;;  %v1749_v9 = vld [vmem:[#allocation5 + $0x2c0] sm:$0xff]   ;;  %v1753_v13 = vld [vmem:[#allocation5 + $0x2c8] sm:$0xff]  }
  0x51   :  { %1564 = vmatprep.subr.bf16.mxu1 %v1697_v25  ;;  %v1745_v6 = vld [vmem:[#allocation2 + $0x30] ss:$8 sps:$4 sm:$0xff]   ;;  %v1747_v7 = vld [vmem:[#allocation2 + $0x34] ss:$8 sps:$4 sm:$0xff]   ;;  %v1750_v10 = vld [vmem:[#allocation5 + $0x200] sm:$0xff]  }
  0x52   :  { %v1751_v11 = vld [vmem:[#allocation5 + $0x280] sm:$0xff]   ;;  %v1754_v14 = vld [vmem:[#allocation5 + $0x208] sm:$0xff]   ;;  %v1756_v16 = vld [vmem:[#allocation5 + $0x250] sm:$0xff]  }
  0x53   :  { %1543 = vmatpush3.bf16.msra.mxu0 %v1698_v26  ;;  %v1755_v15 = vld [vmem:[#allocation5 + $0x288] sm:$0xff]   ;;  %v1757_v17 = vld [vmem:[#allocation5 + $0x2d0] sm:$0xff]   ;;  %v1760_v20 = vld [vmem:[#allocation5 + $0x258] sm:$0xff]  }
  0x54   :  { %1565 = vmatpush3.bf16.msra.mxu1 %v1699_v27  ;;  %1544 = vmatprep.subr.bf16.mxu0 %v1700_v28  ;;  %v1758_v18 = vld [vmem:[#allocation5 + $0x210] sm:$0xff]   ;;  %v1761_v21 = vld [vmem:[#allocation5 + $0x2d8] sm:$0xff]   ;;  %v1764_v24 = vld [vmem:[#allocation5 + $0x260] sm:$0xff]  }
  0x55   :  { %1566 = vmatprep.subr.bf16.mxu1 %v1701_v29  ;;  %v1759_v19 = vld [vmem:[#allocation5 + $0x290] sm:$0xff]   ;;  %v1762_v22 = vld [vmem:[#allocation5 + $0x218] sm:$0xff]   ;;  %v1765_v25 = vld [vmem:[#allocation5 + $0x2e0] sm:$0xff]  }
  0x56   :  { %v1763_v23 = vld [vmem:[#allocation5 + $0x298] sm:$0xff]   ;;  %v1766_v26 = vld [vmem:[#allocation5 + $0x220] sm:$0xff]   ;;  %v1768_v28 = vld [vmem:[#allocation5 + $0x268] sm:$0xff]  }
  0x57   :  { %1545 = vmatpush3.bf16.msra.mxu0 %v1702_v30  ;;  %v1767_v27 = vld [vmem:[#allocation5 + $0x2a0] sm:$0xff]   ;;  %v1769_v29 = vld [vmem:[#allocation5 + $0x2e8] sm:$0xff]   ;;  %v1773_v33 = vld [vmem:[#allocation5 + $0x2f0] sm:$0xff]  }
  0x58   :  { %1567 = vmatpush3.bf16.msra.mxu1 %v1703_v31  ;;  %1574 = vmatprep.subr.bf16.mxu0 %v1710_v36  ;;  %v1770_v30 = vld [vmem:[#allocation5 + $0x228] sm:$0xff]   ;;  %v1775_v35 = vld [vmem:[#allocation5 + $0x2b0] sm:$0xff]   ;;  %v1776_v36 = vld [vmem:[#allocation5 + $0x278] sm:$0xff]  }
  0x59   :  { %1596 = vmatprep.subr.bf16.mxu1 %v1711_v37  ;;  %v1771_v31 = vld [vmem:[#allocation5 + $0x2a8] sm:$0xff]   ;;  %v1777_v37 = vld [vmem:[#allocation5 + $0x2f8] sm:$0xff]  }
  0x5a   :  { %400 = vmatmul.mubr.bf16.vlgmr.msra.gmra.mrb[0].mxu0 %v1704_v32  ;;  %v1772_v32 = vld [vmem:[#allocation5 + $0x270] sm:$0xff]  }
  0x5b   :  { %547 = vmatmul.mubr.bf16.vlgmr.msra.gmra.mrb[0].mxu1 %v1707_v34  ;;  %1575 = vmatpush3.bf16.msra.mxu0 %v1712_v38  ;;  %v1774_v34 = vld [vmem:[#allocation5 + $0x230] sm:$0xff]   ;;  %v1778_v38 = vld [vmem:[#allocation5 + $0x238] sm:$0xff]  }
  0x5c   :  { %1597 = vmatpush3.bf16.msra.mxu1 %v1713_v39  ;;  %1576 = vmatprep.subr.bf16.mxu0 %v1714_v40  ;;  %v1779_v39 = vld [vmem:[#allocation5 + $0x2b8] sm:$0xff]   ;;  %v1780_v40 = vld [vmem:[#allocation2 + $0x40] ss:$8 sps:$4 sm:$0xff]  }
  0x5d   :  { %1598 = vmatprep.subr.bf16.mxu1 %v1715_v41  ;;  %693 = vmatprep.mubr.bf16.mxu0 %v1744_v5  ;;  %v1782_v41 = vld [vmem:[#allocation2 + $0x44] ss:$8 sps:$4 sm:$0xff]  }
  0x5e   :  { %840 = vmatprep.mubr.bf16.mxu1 %v1747_v7 }
  0x5f   :  { %1577 = vmatpush3.bf16.msra.mxu0 %v1716_v42  ;;  %v1783_v42 = vld [vmem:[#allocation2 + $0x50] ss:$8 sps:$4 sm:$0xff]  }
  0x60   :  { %1599 = vmatpush3.bf16.msra.mxu1 %v1717_v43  ;;  %1578 = vmatprep.subr.bf16.mxu0 %v1718_v44  ;;  %v1785_v43 = vld [vmem:[#allocation2 + $0x54] ss:$8 sps:$4 sm:$0xff]  }
  0x61   :  { %1600 = vmatprep.subr.bf16.mxu1 %v1719_v45 }
  0x63   :  { %1579 = vmatpush3.bf16.msra.mxu0 %v1720_v46 }
  0x64   :  { %1601 = vmatpush3.bf16.msra.mxu1 %v1721_v47  ;;  %1580 = vmatprep.subr.bf16.mxu0 %v1722_v48 }
  0x65   :  { %1602 = vmatprep.subr.bf16.mxu1 %v1723_v49 }
  0x67   :  { %1581 = vmatpush3.bf16.msra.mxu0 %v1724_v50 }
  0x68   :  { %1603 = vmatpush3.bf16.msra.mxu1 %v1725_v51  ;;  %1582 = vmatprep.subr.bf16.mxu0 %v1726_v52 }
  0x69   :  { %1604 = vmatprep.subr.bf16.mxu1 %v1727_v53 }
  0x6b   :  { %1583 = vmatpush3.bf16.msra.mxu0 %v1728_v54 }
  0x6c   :  { %1605 = vmatpush3.bf16.msra.mxu1 %v1729_v55  ;;  %1584 = vmatprep.subr.bf16.mxu0 %v1730_v56 }
  0x6d   :  { %1606 = vmatprep.subr.bf16.mxu1 %v1731_v57 }
  0x6f   :  { %1585 = vmatpush3.bf16.msra.mxu0 %v1732_v58 }
  0x70   :  { %1607 = vmatpush3.bf16.msra.mxu1 %v1733_v59  ;;  %1586 = vmatprep.subr.bf16.mxu0 %v1734_v60 }
  0x71   :  { %1608 = vmatprep.subr.bf16.mxu1 %v1735_v61 }
  0x73   :  { %1587 = vmatpush3.bf16.msra.mxu0 %v1736_v62 }
  0x74   :  { %1609 = vmatpush3.bf16.msra.mxu1 %v1737_v63  ;;  %1588 = vmatprep.subr.bf16.mxu0 %v1738_v0 }
  0x75   :  { %1610 = vmatprep.subr.bf16.mxu1 %v1739_v1 }
  0x77   :  { %1589 = vmatpush3.bf16.msra.mxu0 %v1740_v2 }
  0x78   :  { %1611 = vmatpush3.bf16.msra.mxu1 %v1741_v3  ;;  %1618 = vmatprep.subr.bf16.mxu0 %v1748_v8 }
  0x79   :  { %1640 = vmatprep.subr.bf16.mxu1 %v1749_v9 }
  0x7a   :  { %694 = vmatmul.mubr.bf16.vlgmr.msra.gmra.mrb[4].mxu0 %v1742_v4 }
  0x7b   :  { %841 = vmatmul.mubr.bf16.vlgmr.msra.gmra.mrb[4].mxu1 %v1745_v6  ;;  %1619 = vmatpush3.bf16.msra.mxu0 %v1750_v10 }
  0x7c   :  { %1641 = vmatpush3.bf16.msra.mxu1 %v1751_v11  ;;  %1620 = vmatprep.subr.bf16.mxu0 %v1752_v12 }
  0x7d   :  { %1642 = vmatprep.subr.bf16.mxu1 %v1753_v13  ;;  %987 = vmatprep.mubr.bf16.mxu0 %v1782_v41 }
  0x7e   :  { %1134 = vmatprep.mubr.bf16.mxu1 %v1785_v43 }
  0x7f   :  { %1621 = vmatpush3.bf16.msra.mxu0 %v1754_v14 }
  0x80   :  { %1643 = vmatpush3.bf16.msra.mxu1 %v1755_v15  ;;  %1622 = vmatprep.subr.bf16.mxu0 %v1756_v16 }
  0x81   :  { %1644 = vmatprep.subr.bf16.mxu1 %v1757_v17 }
  0x83   :  { %1623 = vmatpush3.bf16.msra.mxu0 %v1758_v18 }
  0x84   :  { %1645 = vmatpush3.bf16.msra.mxu1 %v1759_v19  ;;  %1624 = vmatprep.subr.bf16.mxu0 %v1760_v20 }
  0x85   :  { %1646 = vmatprep.subr.bf16.mxu1 %v1761_v21 }
  0x87   :  { %1625 = vmatpush3.bf16.msra.mxu0 %v1762_v22 }
  0x88   :  { %1647 = vmatpush3.bf16.msra.mxu1 %v1763_v23  ;;  %1626 = vmatprep.subr.bf16.mxu0 %v1764_v24 }
  0x89   :  { %1648 = vmatprep.subr.bf16.mxu1 %v1765_v25 }
  0x8b   :  { %1627 = vmatpush3.bf16.msra.mxu0 %v1766_v26 }
  0x8c   :  { %1649 = vmatpush3.bf16.msra.mxu1 %v1767_v27  ;;  %1628 = vmatprep.subr.bf16.mxu0 %v1768_v28 }
  0x8d   :  { %1650 = vmatprep.subr.bf16.mxu1 %v1769_v29 }
  0x8f   :  { %1629 = vmatpush3.bf16.msra.mxu0 %v1770_v30 }
  0x90   :  { %1651 = vmatpush3.bf16.msra.mxu1 %v1771_v31  ;;  %1630 = vmatprep.subr.bf16.mxu0 %v1772_v32 }
  0x91   :  { %1652 = vmatprep.subr.bf16.mxu1 %v1773_v33 }
  0x93   :  { %1631 = vmatpush3.bf16.msra.mxu0 %v1774_v34 }
  0x94   :  { %1653 = vmatpush3.bf16.msra.mxu1 %v1775_v35  ;;  %1632 = vmatprep.subr.bf16.mxu0 %v1776_v36 }
  0x95   :  { %1654 = vmatprep.subr.bf16.mxu1 %v1777_v37 }
  0x97   :  { %1633 = vmatpush3.bf16.msra.mxu0 %v1778_v38 }
  0x98   :  { %1655 = vmatpush3.bf16.msra.mxu1 %v1779_v39 }
  0x9a   :  { %988 = vmatmul.mubr.bf16.vlgmr.msra.gmra.mrb[8].mxu0 %v1780_v40 }
  0x9b   :  { %1135 = vmatmul.mubr.bf16.vlgmr.msra.gmra.mrb[8].mxu1 %v1783_v42 }
 0x12d   :  { %v1546_v44 = vpop.f32.mrb[0].mxu0 }
 0x12e   :  { %v1568_v45 = vpop.f32.mrb[0].mxu1  ;;  %v1547_v46 = vpop.f32.mrb[1].mxu0 }
 0x12f   :  { %v1961_v47 = vadd.f32 %v1547_v46, %v1546_v44  ;;  %v1569_v48 = vpop.f32.mrb[1].mxu1  ;;  %v1549_v49 = vpop.f32.mrb[2].mxu0 }
 0x130   :  { %v1963_v50 = vadd.f32 %v1569_v48, %v1568_v45  ;;  %v1571_v51 = vpop.f32.mrb[2].mxu1  ;;  %v1550_v52 = vpop.f32.mrb[3].mxu0 }
 0x131   :  { %v1965_v53 = vadd.f32 %v1550_v52, %v1549_v49  ;;  %v1572_v54 = vpop.f32.mrb[3].mxu1 }
 0x132   :  { %v1967_v55 = vadd.f32 %v1572_v54, %v1571_v51  ;;  %v1320_v54 = vlaneseq }
 0x133   :  { %v1143_v56 = vadd.f32 %v1965_v53, %v1961_v47 }
 0x134   :  { %v1150_v57 = vadd.f32 %v1967_v55, %v1963_v50 }
 0x135   :  { %v1144_v58 = vrot.slane %v1143_v56, 4 }
 0x136   :  { %v1151_v59 = vrot.slane %v1150_v57, 4 }
 0x137   :  { %v1145_v60 = vadd.f32 %v1144_v58, %v1143_v56 }
 0x138   :  { %v1152_v61 = vadd.f32 %v1151_v59, %v1150_v57 }
 0x139   :  { %v1146_v62 = vrot.slane %v1145_v60, 2 }
 0x13a   :  { %v1153_v63 = vrot.slane %v1152_v61, 2 }
 0x13b   :  { %v1147_v0 = vadd.f32 %v1146_v62, %v1145_v60  ;;  %v1321_v60 = vshrl.u32 %v1320_v54, 7 }
 0x13c   :  { %v1154_v1 = vadd.f32 %v1153_v63, %v1152_v61  ;;  %v1278_v63 = vld [vmem:[#allocation7] sm:$0x3] }
 0x13d   :  { %v1148_v2 = vrot.slane %v1147_v0, 1 }
 0x13e   :  { %v1155_v3 = vrot.slane %v1154_v1, 1 }
 0x13f   :  { %v1149_v4 = vadd.f32 %v1148_v2, %v1147_v0  ;;  %v1997_v2 = vsub.s32 0, %v1321_v60 }
 0x140   :  { %v1156_v5 = vadd.f32 %v1155_v3, %v1154_v1  ;;  %v1279_v3 = vld [vmem:[#allocation7 + $0x2] sm:$0x3] }
 0x141   :  { %v1973_v6 = vmul.f32 0.0625, %v1149_v4 }
 0x142   :  { %v1975_v7 = vmul.f32 0.0625, %v1156_v5 }
 0x143   :  { %v1191_v8 = vsub.f32 %v1961_v47, %v1973_v6  ;;  %v1192_v9 = vsub.f32 %v1965_v53, %v1973_v6 }
 0x144   :  { %v1193_v10 = vsub.f32 %v1963_v50, %v1975_v7  ;;  %v1194_v11 = vsub.f32 %v1967_v55, %v1975_v7 }
 0x145   :  { %v1203_v12 = vmul.f32 %v1191_v8, %v1191_v8  ;;  %v1204_v13 = vmul.f32 %v1192_v9, %v1192_v9 }
 0x146   :  { %v1205_v14 = vmul.f32 %v1193_v10, %v1193_v10  ;;  %v1206_v15 = vmul.f32 %v1194_v11, %v1194_v11 }
 0x147   :  { %v1215_v16 = vadd.f32 %v1204_v13, %v1203_v12 }
 0x148   :  { %v1222_v17 = vadd.f32 %v1206_v15, %v1205_v14 }
 0x149   :  { %v1216_v18 = vrot.slane %v1215_v16, 4 }
 0x14a   :  { %v1223_v19 = vrot.slane %v1222_v17, 4 }
 0x14b   :  { %v1217_v20 = vadd.f32 %v1216_v18, %v1215_v16 }
 0x14c   :  { %v1224_v21 = vadd.f32 %v1223_v19, %v1222_v17  ;;  %v2009_v17 = vsub.s32 1, %v1321_v60 }
 0x14d   :  { %v1218_v22 = vrot.slane %v1217_v20, 2  ;;  %v1590_v25 = vpop.f32.mrb[4].mxu0 }
 0x14e   :  { %v1225_v23 = vrot.slane %v1224_v21, 2  ;;  %v1591_v27 = vpop.f32.mrb[5].mxu0  ;;  %v1612_v29 = vpop.f32.mrb[4].mxu1 }
 0x14f   :  { %v1219_v24 = vadd.f32 %v1218_v22, %v1217_v20  ;;  %v1985_v30 = vadd.f32 %v1591_v27, %v1590_v25  ;;  %v1593_v31 = vpop.f32.mrb[6].mxu0  ;;  %v1613_v33 = vpop.f32.mrb[5].mxu1 }
 0x150   :  { %v1226_v26 = vadd.f32 %v1225_v23, %v1224_v21  ;;  %v1594_v34 = vpop.f32.mrb[7].mxu0  ;;  %v1987_v36 = vadd.f32 %v1613_v33, %v1612_v29  ;;  %v1615_v37 = vpop.f32.mrb[6].mxu1 }
 0x151   :  { %v1220_v28 = vrot.slane %v1219_v24, 1  ;;  %v1989_v38 = vadd.f32 %v1594_v34, %v1593_v31  ;;  %v1616_v40 = vpop.f32.mrb[7].mxu1 }
 0x152   :  { %v1227_v32 = vrot.slane %v1226_v26, 1  ;;  %v1993_v43 = vadd.f32 %v1616_v40, %v1615_v37 }
 0x153   :  { %v1221_v35 = vadd.f32 %v1220_v28, %v1219_v24  ;;  %v1157_v42 = vadd.f32 %v1989_v38, %v1985_v30 }
 0x154   :  { %v1228_v39 = vadd.f32 %v1227_v32, %v1226_v26  ;;  %v1164_v48 = vadd.f32 %v1993_v43, %v1987_v36 }
 0x155   :  { %v1257_v41 = vmul.f32 0.0625, %v1221_v35  ;;  %v1158_v46 = vrot.slane %v1157_v42, 4 }
 0x156   :  { %v1258_v44 = vmul.f32 0.0625, %v1228_v39  ;;  %v1165_v52 = vrot.slane %v1164_v48, 4 }
 0x157   :  { %v1263_v45 = vadd.f32 1e-05, %v1257_v41  ;;  %v1159_v51 = vadd.f32 %v1158_v46, %v1157_v42 }
 0x158   :  { %v1264_v49 = vadd.f32 1e-05, %v1258_v44  ;;  %v1166_v57 = vadd.f32 %v1165_v52, %v1164_v48 }
 0x159   :  { %1786 = vrsqrt.f32 %v1263_v45  ;;  %v1160_v56 = vrot.slane %v1159_v51, 2 }
 0x15a   :  { %1788 = vrsqrt.f32 %v1264_v49  ;;  %v1167_v59 = vrot.slane %v1166_v57, 2 }
 0x15b   :  { %v1161_v58 = vadd.f32 %v1160_v56, %v1159_v51 }
 0x15c   :  { %v1168_v62 = vadd.f32 %v1167_v59, %v1166_v57 }
 0x15d   :  { %v1162_v61 = vrot.slane %v1161_v58, 1 }
 0x15e   :  { %v1169_v1 = vrot.slane %v1168_v62, 1 }
 0x15f   :  { %v1163_v0 = vadd.f32 %v1162_v61, %v1161_v58 }
 0x160   :  { %v1170_v8 = vadd.f32 %v1169_v1, %v1168_v62 }
 0x161   :  { %v1999_v5 = vmul.f32 0.0625, %v1163_v0 }
 0x162   :  { %v2005_v14 = vmul.f32 0.0625, %v1170_v8 }
 0x163   :  { %v1787_v4 = vpop.eup %1786  ;;  %v1195_v12 = vsub.f32 %v1985_v30, %v1999_v5  ;;  %v1196_v13 = vsub.f32 %v1989_v38, %v1999_v5 }
 0x164   :  { %v1789_v9 = vpop.eup %1788  ;;  %v1284_v10 = vmul.f32 %v1787_v4, %v1278_v63  ;;  %v1197_v25 = vsub.f32 %v1987_v36, %v2005_v14 }
 0x165   :  { %v1285_v11 = vmul.f32 %v1789_v9, %v1279_v3  ;;  %v1207_v20 = vmul.f32 %v1195_v12, %v1195_v12  ;;  %v1208_v21 = vmul.f32 %v1196_v13, %v1196_v13 }
 0x166   :  { %v1290_v15 = vmul.f32 %v1284_v10, %v1973_v6  ;;  %v1323_v16 = vrot.slane %v1284_v10, %v1997_v2  ;;  %v1209_v31 = vmul.f32 %v1197_v25, %v1197_v25  ;;  %v1280_v25 = vld [vmem:[#allocation7 + $0x4] sm:$0x3] }
 0x167   :  { %v1291_v18 = vmul.f32 %v1285_v11, %v1975_v7  ;;  %v1327_v19 = vrot.slane %v1285_v11, %v1997_v2  ;;  %v1229_v28 = vadd.f32 %v1208_v21, %v1207_v20  ;;  %v1198_v7 = vsub.f32 %v1993_v43, %v2005_v14 }
 0x168   :  { %v1302_v22 = vrot.slane %v1290_v15, 7  ;;  %v1344_v23 = vmul.f32 %v1961_v47, %v1323_v16  ;;  %v1345_v24 = vmul.f32 %v1965_v53, %v1323_v16 }
 0x169   :  { %v1303_v26 = vrot.slane %v1291_v18, 7  ;;  %v1346_v6 = vmul.f32 %v1963_v50, %v1327_v19  ;;  %v1347_v27 = vmul.f32 %v1967_v55, %v1327_v19  ;;  %v1230_v33 = vrot.slane %v1229_v28, 4 }
 0x16a   :  { %v1314_v29 = vsub.f32 %v1278_v63, %v1302_v22  ;;  %v1210_v34 = vmul.f32 %v1198_v7, %v1198_v7 }
 0x16b   :  { %v1315_v32 = vsub.f32 %v1279_v3, %v1303_v26  ;;  %v1231_v35 = vadd.f32 %v1230_v33, %v1229_v28 }
 0x16c   :  { %v1359_v47 = vrot.slane %v1314_v29, %v2009_v17  ;;  %v1236_v40 = vadd.f32 %v1210_v34, %v1209_v31 }
 0x16d   :  { %v1363_v53 = vrot.slane %v1315_v32, %v2009_v17  ;;  %v1232_v55 = vrot.slane %v1231_v35, 2  ;;  %v1634_v46 = vpop.f32.mrb[8].mxu0 }
 0x16e   :  { %v1380_v37 = vadd.f32 %v1359_v47, %v1344_v23  ;;  %v1381_v39 = vadd.f32 %v1359_v47, %v1345_v24  ;;  %v1237_v42 = vrot.slane %v1236_v40, 4  ;;  %v1656_v49 = vpop.f32.mrb[8].mxu1  ;;  %v1635_v51 = vpop.f32.mrb[9].mxu0  ;;  %v1281_v47 = vld [vmem:[#allocation7 + $0x6] sm:$0x3] }
 0x16f   :  { %v1382_v50 = vadd.f32 %v1363_v53, %v1346_v6  ;;  %v1383_v41 = vadd.f32 %v1363_v53, %v1347_v27  ;;  %v1233_v44 = vadd.f32 %v1232_v55, %v1231_v35  ;;  %v2023_v54 = vadd.f32 %v1635_v51, %v1634_v46  ;;  %v1657_v56 = vpop.f32.mrb[9].mxu1  ;;  %v1637_v57 = vpop.f32.mrb[10].mxu0 }
 0x170   :  { %1392 = vst [vmem:[#allocation8] sm:$0xff] %v1380_v37  ;;  %1393 = vst [vmem:[#allocation8 + $0x8] sm:$0xff] %v1381_v39  ;;  %v1238_v45 = vadd.f32 %v1237_v42, %v1236_v40  ;;  %v2025_v59 = vadd.f32 %v1657_v56, %v1656_v49  ;;  %v1659_v60 = vpop.f32.mrb[10].mxu1  ;;  %v1638_v61 = vpop.f32.mrb[11].mxu0 }
 0x171   :  { %1394 = vst [vmem:[#allocation8 + $0x10] sm:$0xff] %v1382_v50  ;;  %1395 = vst [vmem:[#allocation8 + $0x18] sm:$0xff] %v1383_v41  ;;  %v1234_v48 = vrot.slane %v1233_v44, 1  ;;  %v2027_v63 = vadd.f32 %v1638_v61, %v1637_v57  ;;  %v1660_v0 = vpop.f32.mrb[11].mxu1 }
 0x172   :  { %v1239_v52 = vrot.slane %v1238_v45, 2  ;;  %v2029_v3 = vadd.f32 %v1660_v0, %v1659_v60 }
 0x173   :  { %v1235_v58 = vadd.f32 %v1234_v48, %v1233_v44  ;;  %v1171_v8 = vadd.f32 %v2027_v63, %v2023_v54 }
 0x174   :  { %v1240_v62 = vadd.f32 %v1239_v52, %v1238_v45  ;;  %v1178_v10 = vadd.f32 %v2029_v3, %v2025_v59 }
 0x175   :  { %v1259_v1 = vmul.f32 0.0625, %v1235_v58  ;;  %v1172_v12 = vrot.slane %v1171_v8, 4 }
 0x176   :  { %v1241_v4 = vrot.slane %v1240_v62, 1  ;;  %v1179_v13 = vrot.slane %v1178_v10, 4 }
 0x177   :  { %v1265_v9 = vadd.f32 1e-05, %v1259_v1  ;;  %v1173_v16 = vadd.f32 %v1172_v12, %v1171_v8 }
 0x178   :  { %v1242_v11 = vadd.f32 %v1241_v4, %v1240_v62  ;;  %v1180_v18 = vadd.f32 %v1179_v13, %v1178_v10 }
 0x179   :  { %1790 = vrsqrt.f32 %v1265_v9  ;;  %v1174_v20 = vrot.slane %v1173_v16, 2 }
 0x17a   :  { %v1260_v15 = vmul.f32 0.0625, %v1242_v11  ;;  %v1181_v21 = vrot.slane %v1180_v18, 2 }
 0x17b   :  { %v1175_v22 = vadd.f32 %v1174_v20, %v1173_v16 }
 0x17c   :  { %v1266_v19 = vadd.f32 1e-05, %v1260_v15  ;;  %v1182_v23 = vadd.f32 %v1181_v21, %v1180_v18 }
 0x17d   :  { %v1176_v24 = vrot.slane %v1175_v22, 1 }
 0x17e   :  { %1792 = vrsqrt.f32 %v1266_v19  ;;  %v1183_v26 = vrot.slane %v1182_v23, 1 }
 0x17f   :  { %v1177_v6 = vadd.f32 %v1176_v24, %v1175_v22  ;;  %v1282_v22 = vld [vmem:[#allocation7 + $0x8] sm:$0x3] }
 0x180   :  { %v1184_v28 = vadd.f32 %v1183_v26, %v1182_v23  ;;  %v1283_v23 = vld [vmem:[#allocation7 + $0xa] sm:$0x3] }
 0x181   :  { %v1189_v7 = vmul.f32 0.0625, %v1177_v6 }
 0x182   :  { %v1190_v31 = vmul.f32 0.0625, %v1184_v28 }
 0x183   :  { %v1791_v27 = vpop.eup %1790  ;;  %v1199_v34 = vsub.f32 %v2023_v54, %v1189_v7  ;;  %v1200_v53 = vsub.f32 %v2027_v63, %v1189_v7 }
 0x184   :  { %v1286_v29 = vmul.f32 %v1791_v27, %v1280_v25  ;;  %v1201_v35 = vsub.f32 %v2025_v59, %v1190_v31  ;;  %v1202_v37 = vsub.f32 %v2029_v3, %v1190_v31 }
 0x185   :  { %v1211_v55 = vmul.f32 %v1199_v34, %v1199_v34 }
 0x186   :  { %v1292_v32 = vmul.f32 %v1286_v29, %v1999_v5  ;;  %v1331_v33 = vrot.slane %v1286_v29, %v1997_v2  ;;  %v1212_v5 = vmul.f32 %v1200_v53, %v1200_v53  ;;  %v1213_v44 = vmul.f32 %v1201_v35, %v1201_v35 }
 0x187   :  { %v1214_v45 = vmul.f32 %v1202_v37, %v1202_v37 }
 0x188   :  { %v1793_v39 = vpop.eup %1792  ;;  %v1304_v40 = vrot.slane %v1292_v32, 7  ;;  %v1348_v50 = vmul.f32 %v1985_v30, %v1331_v33  ;;  %v1349_v41 = vmul.f32 %v1989_v38, %v1331_v33  ;;  %v1243_v51 = vadd.f32 %v1212_v5, %v1211_v55 }
 0x189   :  { %v1287_v42 = vmul.f32 %v1793_v39, %v1281_v47  ;;  %v1250_v52 = vadd.f32 %v1214_v45, %v1213_v44 }
 0x18a   :  { %v1316_v46 = vsub.f32 %v1280_v25, %v1304_v40  ;;  %v1244_v38 = vrot.slane %v1243_v51, 4 }
 0x18b   :  { %v1293_v48 = vmul.f32 %v1287_v42, %v2005_v14  ;;  %v1335_v49 = vrot.slane %v1287_v42, %v1997_v2  ;;  %v1251_v62 = vrot.slane %v1250_v52, 4 }
 0x18c   :  { %v1367_v56 = vrot.slane %v1316_v46, %v2009_v17  ;;  %v1245_v1 = vadd.f32 %v1244_v38, %v1243_v51 }
 0x18d   :  { %v1305_v57 = vrot.slane %v1293_v48, 7  ;;  %v1350_v58 = vmul.f32 %v1987_v36, %v1335_v49  ;;  %v1351_v30 = vmul.f32 %v1993_v43, %v1335_v49  ;;  %v1252_v14 = vadd.f32 %v1251_v62, %v1250_v52 }
 0x18e   :  { %v1384_v60 = vadd.f32 %v1367_v56, %v1348_v50  ;;  %v1385_v61 = vadd.f32 %v1367_v56, %v1349_v41  ;;  %v1246_v8 = vrot.slane %v1245_v1, 2 }
 0x18f   :  { %v1317_v0 = vsub.f32 %v1281_v47, %v1305_v57  ;;  %v1253_v9 = vrot.slane %v1252_v14, 2 }
 0x190   :  { %1396 = vst [vmem:[#allocation8 + $0x20] sm:$0xff] %v1384_v60  ;;  %1397 = vst [vmem:[#allocation8 + $0x28] sm:$0xff] %v1385_v61  ;;  %v1247_v12 = vadd.f32 %v1246_v8, %v1245_v1 }
 0x191   :  { %v1371_v4 = vrot.slane %v1317_v0, %v2009_v17  ;;  %v1254_v13 = vadd.f32 %v1253_v9, %v1252_v14 }
 0x192   :  { %v1248_v36 = vrot.slane %v1247_v12, 1 }
 0x193   :  { %v1386_v10 = vadd.f32 %v1371_v4, %v1350_v58  ;;  %v1387_v11 = vadd.f32 %v1371_v4, %v1351_v30  ;;  %v1255_v43 = vrot.slane %v1254_v13, 1 }
 0x194   :  { %v1249_v15 = vadd.f32 %v1248_v36, %v1247_v12 }
 0x195   :  { %1398 = vst [vmem:[#allocation8 + $0x30] sm:$0xff] %v1386_v10  ;;  %1399 = vst [vmem:[#allocation8 + $0x38] sm:$0xff] %v1387_v11  ;;  %v1256_v16 = vadd.f32 %v1255_v43, %v1254_v13 }
 0x196   :  { %v1261_v18 = vmul.f32 0.0625, %v1249_v15 }
 0x197   :  { %v1262_v19 = vmul.f32 0.0625, %v1256_v16 }
 0x198   :  { %v1267_v20 = vadd.f32 1e-05, %v1261_v18 }
 0x199   :  { %v1268_v21 = vadd.f32 1e-05, %v1262_v19 }
 0x19a   :  { %1794 = vrsqrt.f32 %v1267_v20 }
 0x19b   :  { %1796 = vrsqrt.f32 %v1268_v21 }
 0x1a4   :  { %v1795_v24 = vpop.eup %1794 }
 0x1a5   :  { %v1797_v25 = vpop.eup %1796  ;;  %v1288_v26 = vmul.f32 %v1795_v24, %v1282_v22 }
 0x1a6   :  { %v1289_v6 = vmul.f32 %v1797_v25, %v1283_v23 }
 0x1a7   :  { %v1294_v27 = vmul.f32 %v1288_v26, %v1189_v7  ;;  %v1339_v28 = vrot.slane %v1288_v26, %v1997_v2 }
 0x1a8   :  { %v1295_v29 = vmul.f32 %v1289_v6, %v1190_v31  ;;  %v1343_v32 = vrot.slane %v1289_v6, %v1997_v2 }
 0x1a9   :  { %v1306_v33 = vrot.slane %v1294_v27, 7  ;;  %v1352_v47 = vmul.f32 %v2023_v54, %v1339_v28  ;;  %v1353_v34 = vmul.f32 %v2027_v63, %v1339_v28 }
 0x1aa   :  { %v1307_v53 = vrot.slane %v1295_v29, 7  ;;  %v1354_v35 = vmul.f32 %v2025_v59, %v1343_v32  ;;  %v1355_v37 = vmul.f32 %v2029_v3, %v1343_v32 }
 0x1ab   :  { %v1318_v39 = vsub.f32 %v1282_v22, %v1306_v33 }
 0x1ac   :  { %v1319_v40 = vsub.f32 %v1283_v23, %v1307_v53 }
 0x1ad   :  { %v1375_v50 = vrot.slane %v1318_v39, %v2009_v17 }
 0x1ae   :  { %v1379_v7 = vrot.slane %v1319_v40, %v2009_v17 }
 0x1af   :  { %v1388_v31 = vadd.f32 %v1375_v50, %v1352_v47  ;;  %v1389_v2 = vadd.f32 %v1375_v50, %v1353_v34 }
 0x1b0   :  { %v1390_v41 = vadd.f32 %v1379_v7, %v1354_v35  ;;  %v1391_v55 = vadd.f32 %v1379_v7, %v1355_v37 }
 0x1b1   :  { %1400 = vst [vmem:[#allocation8 + $0x40] sm:$0xff] %v1388_v31  ;;  %1401 = vst [vmem:[#allocation8 + $0x48] sm:$0xff] %v1389_v2 }
 0x1b2   :  { %1402 = vst [vmem:[#allocation8 + $0x50] sm:$0xff] %v1390_v41  ;;  %1403 = vst [vmem:[#allocation8 + $0x58] sm:$0xff] %v1391_v55 }
 0x1b3   :  { %1875 = shalt.err (!%p1872_p0)
}
 0x1b4   :  { %s1876_s29 = scalar_lea.hbm %s2075_s3, 1536 }
 0x1b5   :  { %p1877_p1 = scmp.ne.s32.totalorder %s2075_s3, %s1876_s29  ;;  %p1880_p2 = scmp.lt.u32.totalorder %s1876_s29, %s2075_s3 }
 0x1b7   :  { %p1882_p3 = pnand %p1880_p2, %p1877_p1 }
 0x1b9   :  { %1885 = shalt.err (!%p1882_p3)
}
 0x1ba   :  { %1415 = dma.vmem_to_hbm [thread:$0]  %s1410_s25, 1536, %s2075_s3, [#allocation4], %s1896_s1, %s1896_s1, %s1897_s9  }
 0x1bb   :  { %1890 = dma.done.wait [#allocation4], 1536  }
 0x1bc   :  { %1891 = vsyncadd [#allocation4], 4294965760 }
 0x1bd   :  { %1419 = vsyncpa [#allocation3], 1 }
 0x1be   :  { %1420 = vsyncpa [#allocation6], 1 }
 0x1bf   :  { %1421 = vsyncpa [#allocation4], 1 }

</bundles_post_ra>
